<compile_context>
chip_gen: v5e
topology: v5e:2x2
jax: 0.10.0
libtpu: 0.0.40
codegen_flags: <defaults>
</compile_context>

<pallas_src>
import functools

import jax
import jax.numpy as jnp
from jax import lax
from jax.experimental import pallas as pl
from jax.experimental.pallas import tpu as pltpu


def _rd_kernel(x_ref, out_ref, acc_ref, *, inv_count):
    # x_ref: (16, TN) f32 block -- rows 0:8 are pred diffs, rows 8:16 gt diffs.
    # out_ref: (1, 1) f32 in SMEM.  acc_ref: (8, TN) f32 VMEM accumulator,
    # resident across grid steps.
    i = pl.program_id(0)

    @pl.when(i == 0)
    def _init():
        acc_ref[...] = jnp.zeros_like(acc_ref)

    p = x_ref[0:8, :]                                     # (8, TN)
    g = x_ref[8:16, :]                                    # (8, TN)

    # Sum of squares over the 8 neighbor diffs (small sublane reduce).
    pss = jnp.sum(p * p, axis=0, keepdims=True)           # (1, TN)
    gss = jnp.sum(g * g, axis=0, keepdims=True)

    # masked_fill(norm == 0, 1.0) followed by divide  ==  multiply by
    # (ss == 0 ? 1.0 : rsqrt(ss)).  rsqrt runs on the EUP (own VLIW slot),
    # so we avoid a sqrt plus two full-width divides on the VPU.
    p_inv = jnp.where(pss == 0.0, jnp.float32(1.0), lax.rsqrt(pss))
    g_inv = jnp.where(gss == 0.0, jnp.float32(1.0), lax.rsqrt(gss))

    # Full-width accumulation: loop body stays pure VPU work; zero-padded
    # columns contribute exactly 0.
    acc_ref[...] += jnp.abs(p * p_inv - g * g_inv)

    @pl.when(i == pl.num_programs(0) - 1)
    def _finish():
        # Single cross-lane/cross-sublane reduce + mean scale, done once.
        out_ref[0, 0] = jnp.sum(acc_ref[...]) * jnp.float32(inv_count)


# 8 neighbor offsets, matching compute_rd's cat order:
# top, bottom, left, right, left_top, right_top, left_bottom, right_bottom
_DY = jnp.array([-1, 1, 0, 0, -1, -1, 1, 1], dtype=jnp.int32)
_DX = jnp.array([0, 0, -1, 1, -1, 1, -1, 1], dtype=jnp.int32)


def _relative_depth_slab(depth, ys, xs):
    """depth: (B, 1, H, W) -> (8, B*N) slab of center-minus-neighbor diffs.

    Each column holds the 8 diffs of one (batch, point) pair; column order is
    irrelevant for the mean, so we build the lane-dense layout directly
    instead of producing (M, 8) rows and transposing the full slab.
    """
    d = depth[:, 0].astype(jnp.float32)                   # (B, H, W)
    center = d[:, ys, xs]                                 # (B, N)
    neigh = d[:, ys[None, :] + _DY[:, None], xs[None, :] + _DX[:, None]]  # (B, 8, N)
    diffs = center[:, None, :] - neigh                    # (B, 8, N)
    return jnp.transpose(diffs, (1, 0, 2)).reshape(8, -1)  # (8, B*N)


def rd_loss5(pred, gt, ys, xs, *, max_tile_n=32768):
    """Pallas implementation of RD_loss5.forward (scalar L1 loss)."""
    p_slab = _relative_depth_slab(pred, ys, xs)           # (8, M)
    g_slab = _relative_depth_slab(gt, ys, xs)
    M = p_slab.shape[1]

    # Adaptive tile: a single block for small/medium M, else 32768-column
    # chunks (16*32768*4 B = 2 MiB per input block; double-buffered + the
    # 1 MiB accumulator stays well under every generation's scoped VMEM).
    m128 = ((M + 127) // 128) * 128
    tile_n = min(m128, max_tile_n)
    Mp = ((M + tile_n - 1) // tile_n) * tile_n

    # One combined (16, Mp) slab: pred diffs in rows 0:8, gt diffs in 8:16.
    # Zero-padded columns have sum-of-squares 0 -> inv 1 -> contribute 0.
    x = jnp.concatenate([p_slab, g_slab], axis=0)         # (16, M)
    x = jnp.pad(x, ((0, 0), (0, Mp - M)))                 # (16, Mp)

    inv_count = 1.0 / float(M * 8)                        # L1Loss(reduction='mean')
    kernel = functools.partial(_rd_kernel, inv_count=inv_count)

    out = pl.pallas_call(
        kernel,
        out_shape=jax.ShapeDtypeStruct((1, 1), jnp.float32),
        grid=(Mp // tile_n,),
        in_specs=[pl.BlockSpec((16, tile_n), lambda i: (0, i))],
        out_specs=pl.BlockSpec(memory_space=pltpu.MemorySpace.SMEM),
        scratch_shapes=[pltpu.VMEM((8, tile_n), jnp.float32)],
        compiler_params=pltpu.CompilerParams(
            dimension_semantics=("arbitrary",)),
    )(x)
    return out[0, 0]


def _ref_loss(pred, gt, ys, xs):
    """Pure-JAX reference mirroring the torch module (sqrt + masked divide)."""
    p = _relative_depth_slab(pred, ys, xs).T              # (M, 8)
    g = _relative_depth_slab(gt, ys, xs).T
    pn = jnp.sqrt(jnp.sum(p * p, axis=1, keepdims=True))
    gn = jnp.sqrt(jnp.sum(g * g, axis=1, keepdims=True))
    pn = jnp.where(pn == 0.0, 1.0, pn)
    gn = jnp.where(gn == 0.0, 1.0, gn)
    return jnp.mean(jnp.abs(p / pn - g / gn))


if __name__ == "__main__":
    key = jax.random.PRNGKey(0)
    k_pred, k_gt, k_y, k_x = jax.random.split(key, 4)

    # Small shapes consistent with the module: B*1*H*W depth maps.
    B, H, W = 2, 16, 16
    N_POINTS = 1000  # module uses 1000 random points

    pred = jax.random.uniform(k_pred, (B, 1, H, W), dtype=jnp.float32)
    gt = jax.random.uniform(k_gt, (B, 1, H, W), dtype=jnp.float32)

    # Deterministic "parameter" init: the module's __init__ draws random point
    # positions (np.random.randint(30, 350)); the spatial size here is small,
    # so draw positions in [1, H-2] to keep the +/-1 neighborhoods in bounds.
    ys = jax.random.randint(k_y, (N_POINTS,), 1, H - 1, dtype=jnp.int32)
    xs = jax.random.randint(k_x, (N_POINTS,), 1, W - 1, dtype=jnp.int32)

    loss = rd_loss5(pred, gt, ys, xs)
    jax.block_until_ready(loss)

    ref = _ref_loss(pred, gt, ys, xs)
    assert jnp.allclose(loss, ref, rtol=1e-4, atol=1e-6), (loss, ref)

    print("KERNEL_OK")
</pallas_src>

<mosaic_0001>
module attributes {stable_mosaic.version = 11 : i64} {
  func.func @_rd_kernel(%arg0: i32, %arg1: memref<16x2048xf32, #tpu.memory_space<vmem>>, %arg2: memref<1x1xf32, #tpu.memory_space<smem>>, %arg3: memref<8x2048xf32, #tpu.memory_space<vmem>>) attributes {dimension_semantics = [#tpu.dimension_semantics<arbitrary>], iteration_bounds = array<i64: 1>, scalar_prefetch = 0 : i64, scratch_operands = 1 : i64, tpu.core_type = #tpu.core_type<tc>, window_params = [{transform_indices = @transform_0, window_bounds = array<i64: 16, 2048>}, {transform_indices = @transform_1, window_bounds = array<i64: 1, 1>}]} {
    %c0_i32 = arith.constant 0 : i32
    %0 = arith.cmpi eq, %arg0, %c0_i32 : i32
    %1 = arith.extui %0 : i1 to i32
    %c0_i32_0 = arith.constant 0 : i32
    %2 = arith.cmpi ne, %1, %c0_i32_0 : i32
    scf.if %2 {
      %cst_14 = arith.constant 0.000000e+00 : f32
      %33 = vector.broadcast %cst_14 : f32 to vector<8x2048xf32>
      %c0_15 = arith.constant 0 : index
      %c0_16 = arith.constant 0 : index
      %34 = vector.load %arg3[%c0_15, %c0_16] : memref<8x2048xf32, #tpu.memory_space<vmem>>, vector<8x2048xf32>
      tpu.vector_store %arg3[%c0_15, %c0_16], %33 {strides = array<i32>} : memref<8x2048xf32, #tpu.memory_space<vmem>>, vector<8x2048xf32>,
    } else {
    }
    %c0 = arith.constant 0 : index
    %c0_1 = arith.constant 0 : index
    %3 = vector.load %arg1[%c0, %c0_1] : memref<16x2048xf32, #tpu.memory_space<vmem>>, vector<8x2048xf32>
    %c8 = arith.constant 8 : index
    %c0_2 = arith.constant 0 : index
    %4 = vector.load %arg1[%c8, %c0_2] : memref<16x2048xf32, #tpu.memory_space<vmem>>, vector<8x2048xf32>
    %5 = arith.mulf %3, %3 : vector<8x2048xf32>
    %cst = arith.constant dense<0.000000e+00> : vector<2048xf32>
    %6 = vector.multi_reduction <add>, %5, %cst [0] : vector<8x2048xf32> to vector<2048xf32>
    %7 = vector.shape_cast %6 : vector<2048xf32> to vector<1x2048xf32>
    %8 = arith.mulf %4, %4 : vector<8x2048xf32>
    %cst_3 = arith.constant dense<0.000000e+00> : vector<2048xf32>
    %9 = vector.multi_reduction <add>, %8, %cst_3 [0] : vector<8x2048xf32> to vector<2048xf32>
    %10 = vector.shape_cast %9 : vector<2048xf32> to vector<1x2048xf32>
    %cst_4 = arith.constant 0.000000e+00 : f32
    %11 = vector.broadcast %cst_4 : f32 to vector<1x2048xf32>
    %12 = arith.cmpf oeq, %7, %11 : vector<1x2048xf32>
    %13 = math.rsqrt %7 : vector<1x2048xf32>
    %cst_5 = arith.constant 1.000000e+00 : f32
    %14 = vector.broadcast %cst_5 : f32 to vector<1x2048xf32>
    %15 = arith.select %12, %14, %13 : vector<1x2048xi1>, vector<1x2048xf32>
    %cst_6 = arith.constant 0.000000e+00 : f32
    %16 = vector.broadcast %cst_6 : f32 to vector<1x2048xf32>
    %17 = arith.cmpf oeq, %10, %16 : vector<1x2048xf32>
    %18 = math.rsqrt %10 : vector<1x2048xf32>
    %cst_7 = arith.constant 1.000000e+00 : f32
    %19 = vector.broadcast %cst_7 : f32 to vector<1x2048xf32>
    %20 = arith.select %17, %19, %18 : vector<1x2048xi1>, vector<1x2048xf32>
    %c0_8 = arith.constant 0 : index
    %c0_9 = arith.constant 0 : index
    %21 = vector.load %arg3[%c0_8, %c0_9] : memref<8x2048xf32, #tpu.memory_space<vmem>>, vector<8x2048xf32>
    %22 = vector.broadcast %15 : vector<1x2048xf32> to vector<8x2048xf32>
    %23 = arith.mulf %3, %22 : vector<8x2048xf32>
    %24 = vector.broadcast %20 : vector<1x2048xf32> to vector<8x2048xf32>
    %25 = arith.mulf %4, %24 : vector<8x2048xf32>
    %26 = arith.subf %23, %25 : vector<8x2048xf32>
    %27 = math.absf %26 : vector<8x2048xf32>
    %28 = arith.addf %21, %27 : vector<8x2048xf32>
    %c0_10 = arith.constant 0 : index
    %c0_11 = arith.constant 0 : index
    %29 = vector.load %arg3[%c0_10, %c0_11] : memref<8x2048xf32, #tpu.memory_space<vmem>>, vector<8x2048xf32>
    tpu.vector_store %arg3[%c0_10, %c0_11], %28 {strides = array<i32>} : memref<8x2048xf32, #tpu.memory_space<vmem>>, vector<8x2048xf32>,
    %c0_i32_12 = arith.constant 0 : i32
    %30 = arith.cmpi eq, %arg0, %c0_i32_12 : i32
    %31 = arith.extui %30 : i1 to i32
    %c0_i32_13 = arith.constant 0 : i32
    %32 = arith.cmpi ne, %31, %c0_i32_13 : i32
    scf.if %32 {
      %c0_14 = arith.constant 0 : index
      %c0_15 = arith.constant 0 : index
      %33 = vector.load %arg3[%c0_14, %c0_15] : memref<8x2048xf32, #tpu.memory_space<vmem>>, vector<8x2048xf32>
      %34 = vector.shape_cast %33 : vector<8x2048xf32> to vector<1x8x2048xf32>
      %cst_16 = arith.constant dense<0.000000e+00> : vector<1xf32>
      %35 = vector.multi_reduction <add>, %34, %cst_16 [1, 2] : vector<1x8x2048xf32> to vector<1xf32>
      %36 = vector.shape_cast %35 : vector<1xf32> to vector<1x1x1xf32>
      %37 = vector.extract %36[0, 0, 0] : f32 from vector<1x1x1xf32>
      %cst_17 = arith.constant 6.250000e-05 : f32
      %38 = arith.mulf %37, %cst_17 : f32
      %c0_18 = arith.constant 0 : index
      %c0_19 = arith.constant 0 : index
      %39 = memref.load %arg2[%c0_18, %c0_19] : memref<1x1xf32, #tpu.memory_space<smem>>
      memref.store %38, %arg2[%c0_18, %c0_19] : memref<1x1xf32, #tpu.memory_space<smem>>
    } else {
    }
    return
  }
  func.func @transform_0(%arg0: i32) -> (i32, i32) {
    %c0_i32 = arith.constant 0 : i32
    %c0_i32_0 = arith.constant 0 : i32
    return %c0_i32, %arg0 : i32, i32
  }
  func.func @transform_1(%arg0: i32) -> (i32, i32) {
    %c0_i32 = arith.constant 0 : i32
    %c0_i32_0 = arith.constant 0 : i32
    %c0_i32_1 = arith.constant 0 : i32
    return %c0_i32, %c0_i32_0 : i32, i32
  }
}

</mosaic_0001>

<bundles_post_ra>
// kernel: tpu_custom_call.1
= control target key start
LH: loop header
LB: loop body
LE: loop exit
PB: predicated region body
PF: predicated region fallthrough
CT: control target
= control target key end

     0   :  { %6 = vsyncpa [#allocation4], 0  ;;  %s1952_s0 = inlined_call_operand.hbm [shape: f32[16,2048], index: 0, kind: input, shape index: {}]   ;;  %s1953_s1 = inlined_call_operand.hbm [shape: f32[1,1], index: 1, kind: output, shape index: {}]  }
   0x1   :  { %7 = vsyncpa [#allocation5], 0  ;;  %s12_s8 = sshll.u32 %s1952_s0, 4  ;;  %s999_s9 = smov [#allocation3]   ;;  %s13_s8 = int_to_ptr.hbm [resolvable:$true] %s12_s8 }
   0x2   :  { %s14_s10 = sshll.u32 %s999_s9, 4  ;;  %s1000_s11 = smov 2048   ;;  %s15_s10 = int_to_ptr.vmem [resolvable:$true] %s14_s10 }
   0x3   :  { %s1001_s12 = smov 128  }
   0x4   :  { %20 = dma.hbm_to_vmem [thread:$0]  %s13_s8, 4096, %s15_s10, [#allocation4], %s1000_s11, %s1000_s11, %s1001_s12  }
   0x5   :  { %995 = dma.done.wait [#allocation4], 4096  }
   0x6   :  { %996 = vsyncadd [#allocation4], 4294963200  ;;  %v1016_v0 = vld [vmem:[#allocation3] sm:$0xff]  ;;  %v1018_v1 = vld [vmem:[#allocation3 + $0x8] sm:$0xff]  ;;  %s848_s14 = sshll.u32 %s1953_s1, 4  ;;  %s1002_s17 = smov [#allocation6]   ;;  %s849_s14 = int_to_ptr.hbm [resolvable:$true] %s848_s14 }
   0x7   :  { %1971 = vst [vmem:[#allocation9_spill] sm:$0xff] %v1016_v0  ;;  %v47_v2 = vld [vmem:[#allocation3 + $0x10] sm:$0xff]  ;;  %v48_v3 = vld [vmem:[#allocation3 + $0x18] sm:$0xff]  ;;  %v49_v4 = vld [vmem:[#allocation3 + $0x20] sm:$0xff]  ;;  %v77_v6 = vmul.f32 %v1016_v0, %v1016_v0  ;;  %v78_v9 = vmul.f32 %v1018_v1, %v1018_v1 }
   0x8   :  { %1972 = vst [vmem:[#allocation10_spill] sm:$0xff] %v1018_v1  ;;  %v50_v5 = vld [vmem:[#allocation3 + $0x28] sm:$0xff]  ;;  %v51_v7 = vld [vmem:[#allocation3 + $0x30] sm:$0xff]  ;;  %v52_v8 = vld [vmem:[#allocation3 + $0x38] sm:$0xff]  ;;  %v79_v10 = vmul.f32 %v47_v2, %v47_v2  ;;  %v80_v11 = vmul.f32 %v48_v3, %v48_v3  ;;  %v81_v12 = vmul.f32 %v49_v4, %v49_v4 }
   0x9   :  { %v82_v13 = vmul.f32 %v50_v5, %v50_v5  ;;  %v83_v14 = vmul.f32 %v51_v7, %v51_v7  ;;  %v93_v15 = vrot.slane %v77_v6, 4  ;;  %v84_v16 = vmul.f32 %v52_v8, %v52_v8  ;;  %v53_v17 = vld [vmem:[#allocation3 + $0x40] sm:$0xff]  ;;  %v54_v20 = vld [vmem:[#allocation3 + $0x48] sm:$0xff]  ;;  %v55_v21 = vld [vmem:[#allocation3 + $0x50] sm:$0xff] }
   0xa   :  { %v99_v18 = vrot.slane %v78_v9, 4  ;;  %v105_v19 = vrot.slane %v79_v10, 4  ;;  %v111_v22 = vrot.slane %v80_v11, 4  ;;  %v117_v23 = vrot.slane %v81_v12, 4  ;;  %v56_v25 = vld [vmem:[#allocation3 + $0x58] sm:$0xff]  ;;  %v57_v28 = vld [vmem:[#allocation3 + $0x60] sm:$0xff] }
   0xb   :  { %v123_v24 = vrot.slane %v82_v13, 4  ;;  %v94_v26 = vadd.f32 %v93_v15, %v77_v6  ;;  %v129_v27 = vrot.slane %v83_v14, 4  ;;  %v58_v29 = vld [vmem:[#allocation3 + $0x68] sm:$0xff]  ;;  %v85_v30 = vmul.f32 %v53_v17, %v53_v17  ;;  %v59_v32 = vld [vmem:[#allocation3 + $0x70] sm:$0xff]  ;;  %v60_v33 = vld [vmem:[#allocation3 + $0x78] sm:$0xff] }
   0xc   :  { %v135_v31 = vrot.slane %v84_v16, 4  ;;  %v86_v34 = vmul.f32 %v54_v20, %v54_v20  ;;  %v87_v35 = vmul.f32 %v55_v21, %v55_v21  ;;  %v100_v36 = vadd.f32 %v99_v18, %v78_v9  ;;  %v61_v38 = vld [vmem:[#allocation3 + $0x80] sm:$0xff] }
   0xd   :  { %v106_v37 = vadd.f32 %v105_v19, %v79_v10  ;;  %v88_v39 = vmul.f32 %v56_v25, %v56_v25  ;;  %v112_v40 = vadd.f32 %v111_v22, %v80_v11  ;;  %v118_v41 = vadd.f32 %v117_v23, %v81_v12 }
   0xe   :  { %v124_v42 = vadd.f32 %v123_v24, %v82_v13  ;;  %v89_v43 = vmul.f32 %v57_v28, %v57_v28  ;;  %v90_v44 = vmul.f32 %v58_v29, %v58_v29  ;;  %v95_v45 = vrot.slane %v94_v26, 2 }
   0xf   :  { %v130_v46 = vadd.f32 %v129_v27, %v83_v14  ;;  %v91_v47 = vmul.f32 %v59_v32, %v59_v32  ;;  %v92_v48 = vmul.f32 %v60_v33, %v60_v33  ;;  %v136_v49 = vadd.f32 %v135_v31, %v84_v16  ;;  %v62_v33 = vld [vmem:[#allocation3 + $0x88] sm:$0xff] }
  0x10   :  { %v141_v50 = vrot.slane %v85_v30, 4  ;;  %v101_v51 = vrot.slane %v100_v36, 2  ;;  %v107_v52 = vrot.slane %v106_v37, 2  ;;  %v147_v53 = vrot.slane %v86_v34, 4 }
  0x11   :  { %v1024_v54 = vmul.f32 %v61_v38, %v61_v38  ;;  %v113_v55 = vrot.slane %v112_v40, 2  ;;  %v119_v56 = vrot.slane %v118_v41, 2  ;;  %v125_v57 = vrot.slane %v124_v42, 2 }
  0x12   :  { %v153_v58 = vrot.slane %v87_v35, 4  ;;  %v96_v59 = vadd.f32 %v95_v45, %v94_v26  ;;  %v131_v60 = vrot.slane %v130_v46, 2  ;;  %v159_v61 = vrot.slane %v88_v39, 4 }
  0x13   :  { %v165_v62 = vrot.slane %v89_v43, 4  ;;  %v137_v63 = vrot.slane %v136_v49, 2  ;;  %v142_v2 = vadd.f32 %v141_v50, %v85_v30  ;;  %v171_v3 = vrot.slane %v90_v44, 4 }
  0x14   :  { %v177_v4 = vrot.slane %v91_v47, 4  ;;  %v102_v5 = vadd.f32 %v101_v51, %v100_v36  ;;  %v108_v6 = vadd.f32 %v107_v52, %v106_v37  ;;  %v148_v7 = vadd.f32 %v147_v53, %v86_v34 }
  0x15   :  { %v183_v8 = vrot.slane %v92_v48, 4  ;;  %v114_v9 = vadd.f32 %v113_v55, %v112_v40  ;;  %v120_v10 = vadd.f32 %v119_v56, %v118_v41  ;;  %v126_v11 = vadd.f32 %v125_v57, %v124_v42  ;;  %v63_v42 = vld [vmem:[#allocation3 + $0x90] sm:$0xff] }
  0x16   :  { %v154_v12 = vadd.f32 %v153_v58, %v87_v35  ;;  %v97_v13 = vrot.slane %v96_v59, 1  ;;  %v132_v14 = vadd.f32 %v131_v60, %v130_v46  ;;  %v160_v15 = vadd.f32 %v159_v61, %v88_v39  ;;  %v67_v55 = vld [vmem:[#allocation3 + $0xb0] sm:$0xff]  ;;  %v68_v60 = vld [vmem:[#allocation3 + $0xb8] sm:$0xff] }
  0x17   :  { %v166_v16 = vadd.f32 %v165_v62, %v89_v43  ;;  %v138_v17 = vadd.f32 %v137_v63, %v136_v49  ;;  %v143_v18 = vrot.slane %v142_v2, 2  ;;  %v172_v19 = vadd.f32 %v171_v3, %v90_v44  ;;  %v64_v43 = vld [vmem:[#allocation3 + $0x98] sm:$0xff]  ;;  %v66_v49 = vld [vmem:[#allocation3 + $0xa8] sm:$0xff] }
  0x18   :  { %v178_v20 = vadd.f32 %v177_v4, %v91_v47  ;;  %v103_v21 = vrot.slane %v102_v5, 1  ;;  %v109_v22 = vrot.slane %v108_v6, 1  ;;  %v149_v23 = vrot.slane %v148_v7, 2 }
  0x19   :  { %v184_v24 = vadd.f32 %v183_v8, %v92_v48  ;;  %v115_v25 = vrot.slane %v114_v9, 1  ;;  %v121_v26 = vrot.slane %v120_v10, 1  ;;  %v127_v27 = vrot.slane %v126_v11, 1  ;;  %v65_v48 = vld [vmem:[#allocation3 + $0xa0] sm:$0xff] }
  0x1a   :  { %v155_v28 = vrot.slane %v154_v12, 2  ;;  %v1026_v29 = vadd.f32 %v97_v13, %v96_v59  ;;  %v133_v30 = vrot.slane %v132_v14, 1  ;;  %v161_v31 = vrot.slane %v160_v15, 2 }
  0x1b   :  { %v167_v32 = vrot.slane %v166_v16, 2  ;;  %v139_v34 = vrot.slane %v138_v17, 1  ;;  %v144_v35 = vadd.f32 %v143_v18, %v142_v2  ;;  %v173_v36 = vrot.slane %v172_v19, 2 }
  0x1c   :  { %v179_v37 = vrot.slane %v178_v20, 2  ;;  %v1028_v38 = vadd.f32 %v103_v21, %v102_v5  ;;  %v1030_v39 = vadd.f32 %v109_v22, %v108_v6  ;;  %v150_v40 = vadd.f32 %v149_v23, %v148_v7 }
  0x1d   :  { %v185_v41 = vrot.slane %v184_v24, 2  ;;  %v1032_v44 = vadd.f32 %v115_v25, %v114_v9  ;;  %v1034_v45 = vadd.f32 %v121_v26, %v120_v10  ;;  %v1036_v46 = vadd.f32 %v127_v27, %v126_v11  ;;  %v71_v25 = vld [vmem:[#allocation3 + $0xd0] sm:$0xff] }
  0x1e   :  { %v156_v47 = vadd.f32 %v155_v28, %v154_v12  ;;  %v1038_v50 = vadd.f32 %v133_v30, %v132_v14  ;;  %v162_v51 = vadd.f32 %v161_v31, %v160_v15  ;;  %v168_v52 = vadd.f32 %v167_v32, %v166_v16  ;;  %v69_v15 = vld [vmem:[#allocation3 + $0xc0] sm:$0xff]  ;;  %v72_v31 = vld [vmem:[#allocation3 + $0xd8] sm:$0xff] }
  0x1f   :  { %v190_v53 = vmul.f32 %v62_v33, %v62_v33  ;;  %v1040_v56 = vadd.f32 %v139_v34, %v138_v17  ;;  %v145_v57 = vrot.slane %v144_v35, 1  ;;  %v174_v58 = vadd.f32 %v173_v36, %v172_v19  ;;  %v73_v32 = vld [vmem:[#allocation3 + $0xe0] sm:$0xff] }
  0x20   :  { %1973 = vst [vmem:[#allocation11_spill] sm:$0xff] %v1038_v50  ;;  %v180_v59 = vadd.f32 %v179_v37, %v178_v20  ;;  %v151_v61 = vrot.slane %v150_v40, 1  ;;  %v186_v62 = vadd.f32 %v185_v41, %v184_v24  ;;  %v191_v63 = vmul.f32 %v63_v42, %v63_v42  ;;  %v70_v20 = vld [vmem:[#allocation3 + $0xc8] sm:$0xff] }
  0x21   :  { %1974 = vst [vmem:[#allocation12_spill] sm:$0xff] %v1040_v56  ;;  %v192_v2 = vmul.f32 %v64_v43, %v64_v43  ;;  %v157_v3 = vrot.slane %v156_v47, 1  ;;  %v193_v4 = vmul.f32 %v65_v48, %v65_v48  ;;  %v194_v5 = vmul.f32 %v66_v49, %v66_v49  ;;  %v74_v37 = vld [vmem:[#allocation3 + $0xe8] sm:$0xff] }
  0x22   :  { %v205_v6 = vrot.slane %v1024_v54, 4  ;;  %v163_v7 = vrot.slane %v162_v51, 1  ;;  %v169_v8 = vrot.slane %v168_v52, 1  ;;  %v195_v9 = vmul.f32 %v67_v55, %v67_v55 }
  0x23   :  { %v211_v10 = vrot.slane %v190_v53, 4  ;;  %v1043_v11 = vadd.f32 %v145_v57, %v144_v35  ;;  %v175_v12 = vrot.slane %v174_v58, 1  ;;  %v181_v13 = vrot.slane %v180_v59, 1 }
  0x24   :  { %v196_v14 = vmul.f32 %v68_v60, %v68_v60  ;;  %v1045_v16 = vadd.f32 %v151_v61, %v150_v40  ;;  %v187_v17 = vrot.slane %v186_v62, 1  ;;  %v217_v18 = vrot.slane %v191_v63, 4  ;;  %v75_v40 = vld [vmem:[#allocation3 + $0xf0] sm:$0xff] }
  0x25   :  { %v223_v19 = vrot.slane %v192_v2, 4  ;;  %v1047_v21 = vadd.f32 %v157_v3, %v156_v47  ;;  %v206_v22 = vadd.f32 %v205_v6, %v1024_v54  ;;  %v229_v23 = vrot.slane %v193_v4, 4  ;;  %v76_v47 = vld [vmem:[#allocation3 + $0xf8] sm:$0xff] }
  0x26   :  { %v235_v24 = vrot.slane %v194_v5, 4  ;;  %v1050_v26 = vadd.f32 %v163_v7, %v162_v51  ;;  %v1052_v27 = vadd.f32 %v169_v8, %v168_v52  ;;  %v212_v28 = vadd.f32 %v211_v10, %v190_v53 }
  0x27   :  { %v241_v30 = vrot.slane %v195_v9, 4  ;;  %v1054_v33 = vadd.f32 %v175_v12, %v174_v58  ;;  %v1056_v34 = vadd.f32 %v181_v13, %v180_v59  ;;  %v197_v35 = vmul.f32 %v69_v15, %v69_v15 }
  0x28   :  { %v247_v36 = vrot.slane %v196_v14, 4  ;;  %v1058_v54 = vadd.f32 %v187_v17, %v186_v62  ;;  %v198_v41 = vmul.f32 %v70_v20, %v70_v20  ;;  %v218_v42 = vadd.f32 %v217_v18, %v191_v63 }
  0x29   :  { %v224_v43 = vadd.f32 %v223_v19, %v192_v2  ;;  %v199_v48 = vmul.f32 %v71_v25, %v71_v25  ;;  %v207_v49 = vrot.slane %v206_v22, 2  ;;  %v230_v51 = vadd.f32 %v229_v23, %v193_v4 }
  0x2a   :  { %1975 = vst [vmem:[#allocation13_spill] sm:$0xff] %v1058_v54  ;;  %v236_v52 = vadd.f32 %v235_v24, %v194_v5  ;;  %v200_v53 = vmul.f32 %v72_v31, %v72_v31  ;;  %v201_v55 = vmul.f32 %v73_v32, %v73_v32  ;;  %v213_v57 = vrot.slane %v212_v28, 2 }
  0x2b   :  { %v242_v58 = vadd.f32 %v241_v30, %v195_v9  ;;  %v202_v59 = vmul.f32 %v74_v37, %v74_v37  ;;  %v203_v60 = vmul.f32 %v75_v40, %v75_v40  ;;  %v248_v61 = vadd.f32 %v247_v36, %v196_v14 }
  0x2c   :  { %v253_v3 = vrot.slane %v197_v35, 4  ;;  %v204_v6 = vmul.f32 %v76_v47, %v76_v47  ;;  %v219_v7 = vrot.slane %v218_v42, 2  ;;  %v225_v62 = vrot.slane %v224_v43, 2 }
  0x2d   :  { %v259_v8 = vrot.slane %v198_v41, 4  ;;  %v208_v10 = vadd.f32 %v207_v49, %v206_v22  ;;  %v231_v63 = vrot.slane %v230_v51, 2  ;;  %v237_v2 = vrot.slane %v236_v52, 2 }
  0x2e   :  { %v265_v12 = vrot.slane %v199_v48, 4  ;;  %v214_v13 = vadd.f32 %v213_v57, %v212_v28  ;;  %v243_v15 = vrot.slane %v242_v58, 2  ;;  %v271_v4 = vrot.slane %v200_v53, 4 }
  0x2f   :  { %v277_v5 = vrot.slane %v201_v55, 4  ;;  %v249_v17 = vrot.slane %v248_v61, 2  ;;  %v254_v18 = vadd.f32 %v253_v3, %v197_v35  ;;  %v283_v19 = vrot.slane %v202_v59, 4 }
  0x30   :  { %v289_v9 = vrot.slane %v203_v60, 4  ;;  %v220_v20 = vadd.f32 %v219_v7, %v218_v42  ;;  %v226_v23 = vadd.f32 %v225_v62, %v224_v43  ;;  %v260_v14 = vadd.f32 %v259_v8, %v198_v41 }
  0x31   :  { %v295_v24 = vrot.slane %v204_v6, 4  ;;  %v209_v25 = vrot.slane %v208_v10, 1  ;;  %v232_v30 = vadd.f32 %v231_v63, %v230_v51  ;;  %v238_v31 = vadd.f32 %v237_v2, %v236_v52 }
  0x32   :  { %v266_v32 = vadd.f32 %v265_v12, %v199_v48  ;;  %v215_v22 = vrot.slane %v214_v13, 1  ;;  %v244_v36 = vadd.f32 %v243_v15, %v242_v58  ;;  %v272_v37 = vadd.f32 %v271_v4, %v200_v53 }
  0x33   :  { %v278_v40 = vadd.f32 %v277_v5, %v201_v55  ;;  %v250_v28 = vadd.f32 %v249_v17, %v248_v61  ;;  %v255_v47 = vrot.slane %v254_v18, 2  ;;  %v284_v49 = vadd.f32 %v283_v19, %v202_v59 }
  0x34   :  { %v290_v57 = vadd.f32 %v289_v9, %v203_v60  ;;  %v221_v1 = vrot.slane %v220_v20, 1  ;;  %v261_v35 = vrot.slane %v260_v14, 2  ;;  %v296_v3 = vadd.f32 %v295_v24, %v204_v6 }
  0x35   :  { %865 = vrsqrt.f32 %v1026_v29  ;;  %v227_v42 = vrot.slane %v226_v23, 1  ;;  %v233_v41 = vrot.slane %v232_v30, 1  ;;  %v267_v43 = vrot.slane %v266_v32, 2 }
  0x36   :  { %867 = vrsqrt.f32 %v1028_v38  ;;  %v239_v51 = vrot.slane %v238_v31, 1  ;;  %v273_v48 = vrot.slane %v272_v37, 2  ;;  %v279_v52 = vrot.slane %v278_v40, 2 }
  0x37   :  { %869 = vrsqrt.f32 %v1030_v39  ;;  %v256_v53 = vadd.f32 %v255_v47, %v254_v18  ;;  %v285_v55 = vrot.slane %v284_v49, 2  ;;  %v291_v58 = vrot.slane %v290_v57, 2 }
  0x38   :  { %871 = vrsqrt.f32 %v1032_v44  ;;  %v1064_v59 = vadd.f32 %v209_v25, %v208_v10  ;;  %v262_v60 = vadd.f32 %v261_v35, %v260_v14  ;;  %v297_v61 = vrot.slane %v296_v3, 2 }
  0x39   :  { %873 = vrsqrt.f32 %v1034_v45  ;;  %v1067_v6 = vadd.f32 %v215_v22, %v214_v13  ;;  %v245_v7 = vrot.slane %v244_v36, 1  ;;  %v268_v62 = vadd.f32 %v267_v43, %v266_v32 }
  0x3a   :  { %875 = vrsqrt.f32 %v1036_v46  ;;  %v1072_v63 = vadd.f32 %v221_v1, %v220_v20  ;;  %v251_v2 = vrot.slane %v250_v28, 1  ;;  %v274_v12 = vadd.f32 %v273_v48, %v272_v37 }
  0x3b   :  { %v1070_v8 = vpop.eup %865  ;;  %877 = vrsqrt.f32 %v1038_v50  ;;  %v257_v15 = vrot.slane %v256_v53, 1  ;;  %v280_v4 = vadd.f32 %v279_v52, %v278_v40  ;;  %v286_v5 = vadd.f32 %v285_v55, %v284_v49 }
  0x3c   :  { %v1075_v10 = vpop.eup %867  ;;  %v292_v17 = vadd.f32 %v291_v58, %v290_v57  ;;  %v1079_v18 = vadd.f32 %v227_v42, %v226_v23  ;;  %v1081_v19 = vadd.f32 %v233_v41, %v232_v30  ;;  %v263_v9 = vrot.slane %v262_v60, 1 }
  0x3d   :  { %v1077_v13 = vpop.eup %869  ;;  %v298_v14 = vadd.f32 %v297_v61, %v296_v3  ;;  %v1085_v20 = vadd.f32 %v239_v51, %v238_v31  ;;  %v269_v24 = vrot.slane %v268_v62, 1  ;;  %v318_v25 = vmul.f32 %v1070_v8, %v1026_v29 }
  0x3e   :  { %v1083_v1 = vpop.eup %871  ;;  %879 = vrsqrt.f32 %v1040_v56  ;;  %v1092_v22 = vadd.f32 %v245_v7, %v244_v36  ;;  %v1094_v23 = vadd.f32 %v251_v2, %v250_v28  ;;  %v275_v30 = vrot.slane %v274_v12, 1 }
  0x3f   :  { %v1090_v32 = vpop.eup %873  ;;  %v328_v37 = vmul.f32 %v1075_v10, %v1028_v38  ;;  %v1100_v31 = vadd.f32 %v257_v15, %v256_v53  ;;  %v281_v47 = vrot.slane %v280_v4, 1  ;;  %v287_v49 = vrot.slane %v286_v5, 1 }
  0x40   :  { %v1098_v40 = vpop.eup %875  ;;  %v293_v57 = vrot.slane %v292_v17, 1  ;;  %v1104_v3 = vadd.f32 %v263_v9, %v262_v60  ;;  %v299_v42 = vrot.slane %v298_v14, 1  ;;  %v338_v36 = vmul.f32 %v1077_v13, %v1030_v39 }
  0x41   :  { %1976 = vst [vmem:[#allocation14_spill] sm:$0xff] %v1100_v31  ;;  %v1102_v35 = vpop.eup %877  ;;  %v348_v28 = vmul.f32 %v1083_v1, %v1032_v44  ;;  %v1110_v41 = vadd.f32 %v269_v24, %v268_v62  ;;  %v319_v43 = vmul.f32 %v1070_v8, %v318_v25  ;;  %v358_v51 = vmul.f32 %v1090_v32, %v1034_v45 }
  0x42   :  { %1977 = vst [vmem:[#allocation15_spill] sm:$0xff] %v1104_v3  ;;  %881 = vrsqrt.f32 %v1043_v11  ;;  %v1116_v48 = vadd.f32 %v275_v30, %v274_v12  ;;  %v329_v52 = vmul.f32 %v1075_v10, %v328_v37  ;;  %v368_v53 = vmul.f32 %v1098_v40, %v1036_v46 }
  0x43   :  { %1978 = vst [vmem:[#allocation16_spill] sm:$0xff] %v1110_v41  ;;  %883 = vrsqrt.f32 %v1045_v16  ;;  %v1124_v58 = vadd.f32 %v281_v47, %v280_v4  ;;  %v1126_v60 = vadd.f32 %v287_v49, %v286_v5  ;;  %v1128_v61 = vadd.f32 %v293_v57, %v292_v17 }
  0x44   :  { %1979 = vst [vmem:[#allocation17_spill] sm:$0xff] %v1116_v48  ;;  %v1122_v55 = vpop.eup %879  ;;  %v378_v7 = vmul.f32 %v1102_v35, %v1038_v50  ;;  %v1132_v62 = vadd.f32 %v299_v42, %v298_v14  ;;  %vm323_vm0 = vweird.f32 %v1026_v29  ;;  %v339_v2 = vmul.f32 %v1077_v13, %v338_v36 }
  0x45   :  { %1980 = vst [vmem:[#allocation18_spill] sm:$0xff] %v1124_v58  ;;  %v349_v12 = vmul.f32 %v1083_v1, %v348_v28  ;;  %v320_v15 = vmul.f32 0.5, %v319_v43  ;;  %vm333_vm1 = vweird.f32 %v1028_v38  ;;  %v359_v4 = vmul.f32 %v1090_v32, %v358_v51 }
  0x46   :  { %1981 = vst [vmem:[#allocation19_spill] sm:$0xff] %v1126_v60  ;;  %885 = vrsqrt.f32 %v1047_v21  ;;  %v330_v5 = vmul.f32 0.5, %v329_v52  ;;  %v369_v17 = vmul.f32 %v1098_v40, %v368_v53  ;;  %v388_v9 = vmul.f32 %v1122_v55, %v1040_v56 }
  0x47   :  { %1982 = vst [vmem:[#allocation20_spill] sm:$0xff] %v1128_v61  ;;  %887 = vrsqrt.f32 %v1050_v26  ;;  %vm343_vm2 = vweird.f32 %v1030_v39  ;;  %vm353_vm3 = vweird.f32 %v1032_v44  ;;  %v379_v24 = vmul.f32 %v1102_v35, %v378_v7 }
  0x48   :  { %1983 = vst [vmem:[#allocation21_spill] sm:$0xff] %v1132_v62  ;;  %v1144_v14 = vpop.eup %881  ;;  %889 = vrsqrt.f32 %v1052_v27  ;;  %v340_v30 = vmul.f32 0.5, %v339_v2  ;;  %v350_v37 = vmul.f32 0.5, %v349_v12  ;;  %vm363_vm4 = vweird.f32 %v1034_v45 }
  0x49   :  { %v1150_v25 = vpop.eup %883  ;;  %891 = vrsqrt.f32 %v1054_v33  ;;  %v321_v47 = vsub.f32 1.5, %v320_v15  ;;  %v360_v49 = vmul.f32 0.5, %v359_v4  ;;  %vm373_vm5 = vweird.f32 %v1036_v46 }
  0x4a   :  { %vm383_vm6 = vweird.f32 %v1038_v50  ;;  %v331_v57 = vsub.f32 1.5, %v330_v5  ;;  %v370_v42 = vmul.f32 0.5, %v369_v17  ;;  %v389_v36 = vmul.f32 %v1122_v55, %v388_v9 }
  0x4b   :  { %v398_v28 = vmul.f32 %v1144_v14, %v1043_v11  ;;  %vm324_vm7 = vweird.f32 %v1070_v8  ;;  %vm334_vm8 = vweird.f32 %v1075_v10  ;;  %v380_v51 = vmul.f32 0.5, %v379_v24 }
  0x4c   :  { %v1159_v43 = vpop.eup %885  ;;  %v408_v52 = vmul.f32 %v1150_v25, %v1045_v16  ;;  %v341_v7 = vsub.f32 1.5, %v340_v30  ;;  %vm344_vm9 = vweird.f32 %v1077_v13  ;;  %v351_v2 = vsub.f32 1.5, %v350_v37  ;;  %vm1183_vm13 = vmor %vm323_vm0, %vm324_vm7 }
  0x4d   :  { %v1165_v53 = vpop.eup %887  ;;  %vm393_vm10 = vweird.f32 %v1040_v56  ;;  %893 = vrsqrt.f32 %v1056_v34  ;;  %v1173_v15 = vmul.f32 %v1070_v8, %v321_v47  ;;  %vm354_vm11 = vweird.f32 %v1083_v1  ;;  %vm1195_vm14 = vmor %vm333_vm1, %vm334_vm8 }
  0x4e   :  { %v1170_v12 = vpop.eup %889  ;;  %v361_v4 = vsub.f32 1.5, %v360_v49  ;;  %vm364_vm12 = vweird.f32 %v1090_v32  ;;  %v1188_v9 = vmul.f32 %v1075_v10, %v331_v57  ;;  %v371_v24 = vsub.f32 1.5, %v370_v42  ;;  %vm1211_vm0 = vmor %vm343_vm2, %vm344_vm9 }
  0x4f   :  { %v1177_v5 = vpop.eup %891  ;;  %v390_v30 = vmul.f32 0.5, %v389_v36  ;;  %v399_v37 = vmul.f32 %v1144_v14, %v398_v28  ;;  %v381_v49 = vsub.f32 1.5, %v380_v51  ;;  %v409_v62 = vmul.f32 %v1150_v25, %v408_v52  ;;  %vm1225_vm7 = vmor %vm353_vm3, %vm354_vm11 }
  0x50   :  { %v418_v61 = vmul.f32 %v1159_v43, %v1047_v21  ;;  %895 = vrsqrt.f32 %v1058_v54  ;;  %vm301_vm15 = vcmp.eq.f32.partialorder %v1026_v29, 0.0  ;;  %v1205_v57 = vmul.f32 %v1077_v13, %v341_v7  ;;  %vm1248_vm3 = vmor %vm363_vm4, %vm364_vm12 }
  0x51   :  { %v1216_v36 = vmul.f32 %v1083_v1, %v351_v2  ;;  %vm374_vm1 = vweird.f32 %v1098_v40  ;;  %v428_v28 = vmul.f32 %v1165_v53, %v1050_v26  ;;  %v1230_v52 = vmul.f32 %v1090_v32, %v361_v4 }
  0x52   :  { %vm384_vm2 = vweird.f32 %v1102_v35  ;;  %vm403_vm8 = vweird.f32 %v1043_v11  ;;  %v438_v7 = vmul.f32 %v1170_v12, %v1052_v27  ;;  %v448_v2 = vmul.f32 %v1177_v5, %v1054_v33  ;;  %vm1265_vm4 = vmor %vm373_vm5, %vm374_vm1 }
  0x53   :  { %v1238_v60 = vpop.eup %893  ;;  %v326_v58 = vsel %vm1183_vm13, %v1070_v8, %v1173_v15  ;;  %v1253_v48 = vmul.f32 %v1098_v40, %v371_v24  ;;  %v391_v0 = vsub.f32 1.5, %v390_v30  ;;  %v400_v41 = vmul.f32 0.5, %v399_v37  ;;  %vm1287_vm5 = vmor %vm383_vm6, %vm384_vm2  ;;  %v2033_v15 = vld [vmem:[#allocation15_spill] sm:$0xff] }
  0x54   :  { %1992 = vst [vmem:[#allocation22_spill] sm:$0xff] %v1238_v60  ;;  %v1270_v17 = vmul.f32 %v1102_v35, %v381_v49  ;;  %v410_v24 = vmul.f32 0.5, %v409_v62  ;;  %v419_v30 = vmul.f32 %v1159_v43, %v418_v61  ;;  %v346_v37 = vsel %vm1211_vm0, %v1077_v13, %v1205_v57 }
  0x55   :  { %vm394_vm1 = vweird.f32 %v1122_v55  ;;  %v429_v61 = vmul.f32 %v1165_v53, %v428_v28  ;;  %v439_v57 = vmul.f32 %v1170_v12, %v438_v7  ;;  %v449_v42 = vmul.f32 %v1177_v5, %v448_v2 }
  0x56   :  { %v1294_v13 = vpop.eup %895  ;;  %v458_v8 = vmul.f32 %v1238_v60, %v1056_v34  ;;  %v1310_v3 = vmul.f32 %v1122_v55, %v391_v0  ;;  %v401_v31 = vsub.f32 1.5, %v400_v41  ;;  %vm404_vm6 = vweird.f32 %v1144_v14  ;;  %vm1324_vm11 = vmor %vm393_vm10, %vm394_vm1 }
  0x57   :  { %v411_v41 = vsub.f32 1.5, %v410_v24  ;;  %vm414_vm2 = vweird.f32 %v1150_v25  ;;  %v420_v2 = vmul.f32 0.5, %v419_v30  ;;  %vm424_vm9 = vweird.f32 %v1159_v43  ;;  %vm1358_vm0 = vmor %vm403_vm8, %vm404_vm6 }
  0x58   :  { %v430_v28 = vmul.f32 0.5, %v429_v61  ;;  %vm443_vm12 = vweird.f32 %v1052_v27  ;;  %v468_v7 = vmul.f32 %v1294_v13, %v1058_v54  ;;  %v440_v49 = vmul.f32 0.5, %v439_v57 }
  0x59   :  { %v450_v50 = vmul.f32 0.5, %v449_v42  ;;  %v459_v24 = vmul.f32 %v1238_v60, %v458_v8  ;;  %897 = vrsqrt.f32 %v1064_v59  ;;  %v396_v30 = vsel %vm1324_vm11, %v1122_v55, %v1310_v3 }
  0x5a   :  { %v402_v61 = vmul.f32 %v1144_v14, %v401_v31  ;;  %vm453_vm1 = vweird.f32 %v1054_v33  ;;  %899 = vrsqrt.f32 %v1067_v6  ;;  %v412_v54 = vmul.f32 %v1150_v25, %v411_v41 }
  0x5b   :  { %v421_v56 = vsub.f32 1.5, %v420_v2  ;;  %v1349_v8 = vsel %vm301_vm15, 1.0, %v326_v58  ;;  %901 = vrsqrt.f32 %v1072_v63  ;;  %v431_v3 = vsub.f32 1.5, %v430_v28 }
  0x5c   :  { %vm434_vm10 = vweird.f32 %v1165_v53  ;;  %v469_v29 = vmul.f32 %v1294_v13, %v468_v7  ;;  %903 = vrsqrt.f32 %v1079_v18  ;;  %v441_v55 = vsub.f32 1.5, %v440_v49 }
  0x5d   :  { %v451_v58 = vsub.f32 1.5, %v450_v50  ;;  %v460_v57 = vmul.f32 0.5, %v459_v24  ;;  %905 = vrsqrt.f32 %v1081_v19  ;;  %vm2003_vm8 = vweird.f32 %v1045_v16 }
  0x5e   :  { %vm1372_vm6 = vmor %vm2003_vm8, %vm414_vm2  ;;  %vm444_vm13 = vweird.f32 %v1170_v12  ;;  %v2006_v50 = vsel %vm1195_vm14, %v1075_v10, %v1188_v9  ;;  %vm2007_vm15 = vcmp.eq.f32.partialorder %v1028_v38, 0.0  ;;  %vm2008_vm11 = vcmp.eq.f32.partialorder %v1030_v39, 0.0 }
  0x5f   :  { %v1384_v49 = vsel %vm2007_vm15, 1.0, %v2006_v50  ;;  %v1388_v28 = vsel %vm2008_vm11, 1.0, %v346_v37  ;;  %907 = vrsqrt.f32 %v1085_v20  ;;  %v1391_v7 = vpop.eup %897  ;;  %v406_v0 = vsel %vm1358_vm0, %v1144_v14, %v402_v61 }
  0x60   :  { %vm2009_vm14 = vweird.f32 %v1047_v21  ;;  %vm454_vm15 = vweird.f32 %v1177_v5  ;;  %v2012_v39 = vsel %vm1225_vm7, %v1083_v1, %v1216_v36  ;;  %vm2013_vm11 = vcmp.eq.f32.partialorder %v1032_v44, 0.0  ;;  %v1415_v14 = vpop.eup %899  ;;  %vm1438_vm7 = vmor %vm443_vm12, %vm444_vm13 }
  0x61   :  { %vm1400_vm2 = vmor %vm2009_vm14, %vm424_vm9  ;;  %v1412_v10 = vsel %vm2013_vm11, 1.0, %v2012_v39  ;;  %909 = vrsqrt.f32 %v1092_v22  ;;  %v422_v9 = vmul.f32 %v1159_v43, %v421_v56  ;;  %v432_v47 = vmul.f32 %v1165_v53, %v431_v3  ;;  %v1428_v44 = vpop.eup %901 }
  0x62   :  { %vm2014_vm9 = vweird.f32 %v1050_v26  ;;  %v470_v1 = vmul.f32 0.5, %v469_v29  ;;  %911 = vrsqrt.f32 %v1094_v23  ;;  %v416_v36 = vsel %vm1372_vm6, %v1150_v25, %v412_v54  ;;  %v1443_v24 = vpop.eup %903  ;;  %v2026_v29 = vld [vmem:[#allocation11_spill] sm:$0xff] }
  0x63   :  { %vm1423_vm0 = vmor %vm2014_vm9, %vm434_vm10  ;;  %v442_v56 = vmul.f32 %v1170_v12, %v441_v55  ;;  %v452_v41 = vmul.f32 %v1177_v5, %v451_v58  ;;  %v461_v2 = vsub.f32 1.5, %v460_v57  ;;  %v2021_v25 = vsel %vm1248_vm3, %v1090_v32, %v1230_v52  ;;  %v1481_v52 = vpop.eup %905 }
  0x64   :  { %vm1449_vm10 = vmor %vm453_vm1, %vm454_vm15  ;;  %vm2022_vm12 = vcmp.eq.f32.partialorder %v1034_v45, 0.0  ;;  %v2023_v31 = vsel %vm1265_vm4, %v1098_v40, %v1253_v48  ;;  %vm2024_vm13 = vcmp.eq.f32.partialorder %v1036_v46, 0.0  ;;  %v2025_v4 = vsel %vm1287_vm5, %v1102_v35, %v1270_v17  ;;  %v2028_v45 = vld [vmem:[#allocation14_spill] sm:$0xff]  ;;  %v2029_v40 = vld [vmem:[#allocation12_spill] sm:$0xff] }
  0x65   :  { %v1460_v61 = vsel %vm2022_vm12, 1.0, %v2021_v25  ;;  %v1469_v3 = vsel %vm2024_vm13, 1.0, %v2023_v31  ;;  %vm2027_vm3 = vcmp.eq.f32.partialorder %v2026_v29, 0.0  ;;  %913 = vrsqrt.f32 %v2028_v45  ;;  %v1493_v35 = vpop.eup %907 }
  0x66   :  { %v1478_v32 = vsel %vm2027_vm3, 1.0, %v2025_v4  ;;  %vm464_vm1 = vweird.f32 %v1238_v60  ;;  %vm2030_vm4 = vcmp.eq.f32.partialorder %v2029_v40, 0.0  ;;  %vm2031_vm8 = vcmp.eq.f32.partialorder %v1043_v11, 0.0 }
  0x67   :  { %v1486_v46 = vsel %vm2030_vm4, 1.0, %v396_v30  ;;  %v1490_v48 = vsel %vm2031_vm8, 1.0, %v406_v0  ;;  %915 = vrsqrt.f32 %v2033_v15  ;;  %v426_v17 = vsel %vm1400_vm2, %v1159_v43, %v422_v9  ;;  %v1505_v11 = vpop.eup %909  ;;  %v2041_v0 = vld [vmem:[#allocation16_spill] sm:$0xff] }
  0x68   :  { %2032 = vst [vmem:[#allocation11_spill] sm:$0xff] %v1490_v48  ;;  %v436_v62 = vsel %vm1423_vm0, %v1165_v53, %v432_v47  ;;  %v471_v55 = vsub.f32 1.5, %v470_v1  ;;  %vm2034_vm5 = vcmp.eq.f32.partialorder %v1045_v16, 0.0  ;;  %v446_v58 = vsel %vm1438_vm7, %v1170_v12, %v442_v56  ;;  %v1518_v42 = vpop.eup %911  ;;  %v2059_v56 = vld [vmem:[#allocation19_spill] sm:$0xff] }
  0x69   :  { %v1503_v30 = vsel %vm2034_vm5, 1.0, %v416_v36  ;;  %v456_v57 = vsel %vm1449_vm10, %v1177_v5, %v452_v41  ;;  %v1514_v43 = vmul.f32 %v1238_v60, %v461_v2  ;;  %v510_v53 = vmul.f32 %v1391_v7, %v1064_v59 }
  0x6a   :  { %2035 = vst [vmem:[#allocation14_spill] sm:$0xff] %v1503_v30  ;;  %vm2037_vm6 = vweird.f32 %v1056_v34  ;;  %v2038_v16 = vmov 0  ;;  %v520_v12 = vmul.f32 %v1415_v14, %v1067_v6  ;;  %v530_v5 = vmul.f32 %v1428_v44, %v1072_v63 }
  0x6b   :  { %2036 = vst [vmem:[#allocation12_spill] sm:$0xff] %v1514_v43  ;;  %vm1524_vm14 = vmor %vm2037_vm6, %vm464_vm1  ;;  %v540_v50 = vmul.f32 %v1443_v24, %v1079_v18  ;;  %917 = vrsqrt.f32 %v2041_v0  ;;  %vm2042_vm2 = vcmp.eq.f32.partialorder %v1047_v21, 0.0  ;;  %vm2044_vm15 = vcmp.eq.f32.partialorder %v1050_v26, 0.0  ;;  %v1547_v51 = vpop.eup %913 }
  0x6c   :  { %v2039_v16 = vsel %vm1524_vm14, 4294967295, %v2038_v16  ;;  %v1537_v38 = vsel %vm2042_vm2, 1.0, %v426_v17  ;;  %v1541_v39 = vsel %vm2044_vm15, 1.0, %v436_v62  ;;  %v550_v9 = vmul.f32 %v1481_v52, %v1081_v19 }
  0x6d   :  { %2040 = vst [vmem:[#allocation15_spill] sm:$0xff] %v2039_v16  ;;  %v560_v47 = vmul.f32 %v1493_v35, %v1085_v20  ;;  %v1550_v1 = vmul.f32 %v1294_v13, %v471_v55  ;;  %vm2047_vm11 = vcmp.eq.f32.partialorder %v1052_v27, 0.0  ;;  %vm515_vm9 = vweird.f32 %v1064_v59  ;;  %v1559_v36 = vpop.eup %915 }
  0x6e   :  { %2043 = vst [vmem:[#allocation16_spill] sm:$0xff] %v1537_v38  ;;  %v1554_v21 = vsel %vm2047_vm11, 1.0, %v446_v58  ;;  %v570_v26 = vmul.f32 %v1505_v11, %v1092_v22  ;;  %vm2049_vm0 = vcmp.eq.f32.partialorder %v1054_v33, 0.0  ;;  %v511_v27 = vmul.f32 %v1391_v7, %v510_v53  ;;  %v2051_v58 = vld [vmem:[#allocation9_spill] sm:$0xff] }
  0x6f   :  { %2045 = vst [vmem:[#allocation23_spill] sm:$0xff] %v1541_v39  ;;  %v1567_v37 = vsel %vm2049_vm0, 1.0, %v456_v57  ;;  %v580_v41 = vmul.f32 %v1518_v42, %v1094_v23  ;;  %v521_v2 = vmul.f32 %v1415_v14, %v520_v12  ;;  %vm525_vm7 = vweird.f32 %v1067_v6 }
  0x70   :  { %2046 = vst [vmem:[#allocation24_spill] sm:$0xff] %v1550_v1  ;;  %v531_v54 = vmul.f32 %v1428_v44, %v530_v5  ;;  %v541_v25 = vmul.f32 %v1443_v24, %v540_v50  ;;  %vm535_vm10 = vweird.f32 %v1072_v63  ;;  %vm545_vm12 = vweird.f32 %v1079_v18  ;;  %v2052_v50 = vld [vmem:[#allocation10_spill] sm:$0xff]  ;;  %v2070_v1 = vld [vmem:[#allocation21_spill] sm:$0xff] }
  0x71   :  { %2048 = vst [vmem:[#allocation25_spill] sm:$0xff] %v1554_v21  ;;  %v551_v33 = vmul.f32 %v1481_v52, %v550_v9  ;;  %v561_v31 = vmul.f32 %v1493_v35, %v560_v47  ;;  %v1580_v4 = vpop.eup %917  ;;  %vm555_vm13 = vweird.f32 %v1081_v19  ;;  %v571_v29 = vmul.f32 %v1505_v11, %v570_v26  ;;  %v2064_v21 = vld [vmem:[#allocation20_spill] sm:$0xff] }
  0x72   :  { %2050 = vst [vmem:[#allocation26_spill] sm:$0xff] %v1567_v37  ;;  %v590_v40 = vmul.f32 %v1547_v51, %v2028_v45  ;;  %v600_v17 = vmul.f32 %v1559_v36, %v2033_v15  ;;  %v512_v62 = vmul.f32 0.5, %v511_v27  ;;  %vm516_vm3 = vweird.f32 %v1391_v7 }
  0x73   :  { %v581_v55 = vmul.f32 %v1518_v42, %v580_v41  ;;  %v1593_v57 = vmul.f32 %v1349_v8, %v2051_v58  ;;  %v522_v53 = vmul.f32 0.5, %v521_v2  ;;  %v532_v12 = vmul.f32 0.5, %v531_v54  ;;  %v2053_v54 = vld [vmem:[#allocation17_spill] sm:$0xff]  ;;  %vm1620_vm15 = vmor %vm515_vm9, %vm516_vm3 }
  0x74   :  { %v542_v5 = vmul.f32 0.5, %v541_v25  ;;  %v1598_v9 = vmul.f32 %v1384_v49, %v2052_v50  ;;  %vm526_vm8 = vweird.f32 %v1415_v14  ;;  %v552_v47 = vmul.f32 0.5, %v551_v33 }
  0x75   :  { %v562_v26 = vmul.f32 0.5, %v561_v31  ;;  %v610_v27 = vmul.f32 %v1580_v4, %v2041_v0  ;;  %v572_v8 = vmul.f32 0.5, %v571_v29  ;;  %v591_v41 = vmul.f32 %v1547_v51, %v590_v40  ;;  %v2054_v29 = vld [vmem:[#allocation18_spill] sm:$0xff]  ;;  %vm1631_vm1 = vmor %vm525_vm7, %vm526_vm8 }
  0x76   :  { %v601_v2 = vmul.f32 %v1559_v36, %v600_v17  ;;  %919 = vrsqrt.f32 %v2053_v54  ;;  %v513_v25 = vsub.f32 1.5, %v512_v62  ;;  %vm536_vm6 = vweird.f32 %v1428_v44 }
  0x77   :  { %vm546_vm2 = vweird.f32 %v1443_v24  ;;  %v582_v49 = vmul.f32 0.5, %v581_v55  ;;  %v523_v33 = vsub.f32 1.5, %v522_v53  ;;  %v533_v31 = vsub.f32 1.5, %v532_v12  ;;  %vm1643_vm5 = vmor %vm535_vm10, %vm536_vm6 }
  0x78   :  { %v543_v58 = vsub.f32 1.5, %v542_v5  ;;  %921 = vrsqrt.f32 %v2054_v29  ;;  %vm493_vm0 = vcmp.eq.f32.partialorder %v1064_v59, 0.0  ;;  %v553_v17 = vsub.f32 1.5, %v552_v47  ;;  %vm1659_vm10 = vmor %vm545_vm12, %vm546_vm2 }
  0x79   :  { %vm556_vm11 = vweird.f32 %v1481_v52  ;;  %v563_v62 = vsub.f32 1.5, %v562_v26  ;;  %v611_v55 = vmul.f32 %v1580_v4, %v610_v27  ;;  %v573_v12 = vsub.f32 1.5, %v572_v8 }
  0x7a   :  { %v592_v5 = vmul.f32 0.5, %v591_v41  ;;  %v602_v50 = vmul.f32 0.5, %v601_v2  ;;  %923 = vrsqrt.f32 %v2059_v56  ;;  %v514_v47 = vmul.f32 %v1391_v7, %v513_v25  ;;  %vm1670_vm3 = vmor %vm555_vm13, %vm556_vm11 }
  0x7b   :  { %vm566_vm7 = vweird.f32 %v1493_v35  ;;  %vm576_vm8 = vweird.f32 %v1505_v11  ;;  %v583_v27 = vsub.f32 1.5, %v582_v49  ;;  %vm615_vm4 = vweird.f32 %v2041_v0 }
  0x7c   :  { %v1650_v8 = vpop.eup %919  ;;  %v524_v41 = vmul.f32 %v1415_v14, %v523_v33  ;;  %v534_v2 = vmul.f32 %v1428_v44, %v533_v31  ;;  %v544_v25 = vmul.f32 %v1443_v24, %v543_v58  ;;  %925 = vrsqrt.f32 %v2064_v21 }
  0x7d   :  { %v554_v49 = vmul.f32 %v1481_v52, %v553_v17  ;;  %v564_v31 = vmul.f32 %v1493_v35, %v563_v62  ;;  %vm586_vm12 = vweird.f32 %v1518_v42  ;;  %v612_v58 = vmul.f32 0.5, %v611_v55 }
  0x7e   :  { %v1676_v43 = vpop.eup %921  ;;  %vm2067_vm2 = vweird.f32 %v1085_v20  ;;  %v574_v60 = vmul.f32 %v1505_v11, %v573_v12  ;;  %v593_v16 = vsub.f32 1.5, %v592_v5  ;;  %v603_v39 = vsub.f32 1.5, %v602_v50  ;;  %v929_v5 = vld [vmem:[#allocation3 + $0x10] sm:$0xff] }
  0x7f   :  { %vm1682_vm6 = vmor %vm2067_vm2, %vm566_vm7  ;;  %927 = vrsqrt.f32 %v2070_v1  ;;  %vm501_vm13 = vcmp.eq.f32.partialorder %v2028_v45, 0.0  ;;  %vm2071_vm11 = vweird.f32 %v1092_v22  ;;  %v584_v55 = vmul.f32 %v1518_v42, %v583_v27 }
  0x80   :  { %vm1693_vm9 = vmor %vm2071_vm11, %vm576_vm8  ;;  %vm596_vm7 = vweird.f32 %v1547_v51  ;;  %v620_v12 = vmul.f32 %v1650_v8, %v2053_v54  ;;  %v1702_v50 = vmul.f32 %v929_v5, %v1388_v28  ;;  %v1704_v38 = vpop.eup %923  ;;  %v518_v30 = vsel %vm1620_vm15, %v1391_v7, %v514_v47 }
  0x81   :  { %v528_v48 = vsel %vm1631_vm1, %v1415_v14, %v524_v41  ;;  %v538_v27 = vsel %vm1643_vm5, %v1428_v44, %v534_v2  ;;  %vm2074_vm8 = vweird.f32 %v1094_v23  ;;  %vm606_vm11 = vweird.f32 %v1559_v36 }
  0x82   :  { %vm1719_vm2 = vmor %vm2074_vm8, %vm586_vm12  ;;  %v548_v7 = vsel %vm1659_vm10, %v1443_v24, %v544_v25  ;;  %v558_v14 = vsel %vm1670_vm3, %v1481_v52, %v554_v49  ;;  %v613_v40 = vsub.f32 1.5, %v612_v58  ;;  %v630_v44 = vmul.f32 %v1676_v43, %v2054_v29  ;;  %v1732_v53 = vpop.eup %925  ;;  %v930_v58 = vld [vmem:[#allocation3 + $0x80] sm:$0xff] }
  0x83   :  { %vm502_vm1 = vcmp.eq.f32.partialorder %v2033_v15, 0.0  ;;  %v568_v47 = vsel %vm1682_vm6, %v1493_v35, %v564_v31  ;;  %v578_v24 = vsel %vm1693_vm9, %v1505_v11, %v574_v60  ;;  %v594_v37 = vmul.f32 %v1547_v51, %v593_v16 }
  0x84   :  { %vm2077_vm5 = vweird.f32 %v2028_v45  ;;  %v1751_v26 = vmul.f32 %v1559_v36, %v603_v39  ;;  %v588_v35 = vsel %vm1719_vm2, %v1518_v42, %v584_v55  ;;  %vm2080_vm3 = vweird.f32 %v2033_v15 }
  0x85   :  { %vm1746_vm15 = vmor %vm2077_vm5, %vm596_vm7  ;;  %vm616_vm10 = vweird.f32 %v1580_v4  ;;  %v621_v11 = vmul.f32 %v1650_v8, %v620_v12  ;;  %v640_v16 = vmul.f32 %v1704_v38, %v2059_v56  ;;  %v1766_v41 = vpop.eup %927  ;;  %v669_v39 = vsel %vm493_vm0, 1.0, %v518_v30 }
  0x86   :  { %vm1758_vm9 = vmor %vm2080_vm3, %vm606_vm11  ;;  %vm2083_vm6 = vcmp.eq.f32.partialorder %v1067_v6, 0.0  ;;  %vm2084_vm12 = vcmp.eq.f32.partialorder %v1072_v63, 0.0  ;;  %vm2085_vm7 = vcmp.eq.f32.partialorder %v1079_v18, 0.0  ;;  %v1777_v49 = vmul.f32 %v1580_v4, %v613_v40  ;;  %v934_v40 = vld [vmem:[#allocation3 + $0x98] sm:$0xff] }
  0x87   :  { %v670_v42 = vsel %vm2083_vm6, 1.0, %v528_v48  ;;  %v671_v2 = vsel %vm2084_vm12, 1.0, %v538_v27  ;;  %v672_v25 = vsel %vm2085_vm7, 1.0, %v548_v7  ;;  %vm625_vm8 = vweird.f32 %v2053_v54  ;;  %vm1797_vm11 = vmor %vm615_vm4, %vm616_vm10  ;;  %v2092_v7 = vld [vmem:[#allocation13_spill] sm:$0xff] }
  0x88   :  { %v631_v33 = vmul.f32 %v1676_v43, %v630_v44  ;;  %v650_v59 = vmul.f32 %v1732_v53, %v2064_v21  ;;  %vm2086_vm0 = vcmp.eq.f32.partialorder %v1081_v19, 0.0  ;;  %vm503_vm2 = vcmp.eq.f32.partialorder %v2041_v0, 0.0 }
  0x89   :  { %v673_v6 = vsel %vm2086_vm0, 1.0, %v558_v14  ;;  %v598_v63 = vsel %vm1746_vm15, %v1547_v51, %v594_v37  ;;  %v608_v18 = vsel %vm1758_vm9, %v1559_v36, %v1751_v26  ;;  %vm2089_vm5 = vcmp.eq.f32.partialorder %v1085_v20, 0.0  ;;  %v931_v20 = vld [vmem:[#allocation3 + $0x88] sm:$0xff]  ;;  %v933_v14 = vld [vmem:[#allocation3 + $0x18] sm:$0xff]  ;;  %v935_v26 = vld [vmem:[#allocation3 + $0x20] sm:$0xff] }
  0x8a   :  { %v674_v19 = vsel %vm2089_vm5, 1.0, %v568_v47  ;;  %vm2090_vm3 = vcmp.eq.f32.partialorder %v1092_v22, 0.0  ;;  %v622_v51 = vmul.f32 0.5, %v621_v11  ;;  %vm635_vm15 = vweird.f32 %v2054_v29  ;;  %v932_v22 = vld [vmem:[#allocation3 + $0x90] sm:$0xff] }
  0x8b   :  { %v675_v30 = vsel %vm2090_vm3, 1.0, %v578_v24  ;;  %v641_v31 = vmul.f32 %v1704_v38, %v640_v16  ;;  %v660_v36 = vmul.f32 %v1766_v41, %v2070_v1  ;;  %v717_v17 = vmul.f32 %v930_v58, %v669_v39  ;;  %v941_v58 = vld [vmem:[#allocation3 + $0x38] sm:$0xff] }
  0x8c   :  { %vm626_vm4 = vweird.f32 %v1650_v8  ;;  %vm2091_vm9 = vcmp.eq.f32.partialorder %v1094_v23, 0.0  ;;  %v718_v55 = vmul.f32 %v931_v20, %v670_v42  ;;  %v719_v12 = vmul.f32 %v932_v22, %v671_v2  ;;  %v937_v42 = vld [vmem:[#allocation3 + $0x28] sm:$0xff]  ;;  %v938_v2 = vld [vmem:[#allocation3 + $0x30] sm:$0xff]  ;;  %v942_v20 = vld [vmem:[#allocation3 + $0xb8] sm:$0xff] }
  0x8d   :  { %v1812_v62 = vsel %vm2091_vm9, 1.0, %v588_v35  ;;  %v618_v5 = vsel %vm1797_vm11, %v1580_v4, %v1777_v49  ;;  %v632_v27 = vmul.f32 0.5, %v631_v33  ;;  %vm636_vm10 = vweird.f32 %v1676_v43  ;;  %v936_v35 = vld [vmem:[#allocation3 + $0xa0] sm:$0xff]  ;;  %vm1850_vm9 = vmor %vm625_vm8, %vm626_vm4 }
  0x8e   :  { %vm645_vm6 = vweird.f32 %v2059_v56  ;;  %v651_v28 = vmul.f32 %v1732_v53, %v650_v59  ;;  %vm473_vm12 = vweird.f32 %v2092_v7  ;;  %vm474_vm7 = vweird.f32 %v1294_v13  ;;  %vm1864_vm4 = vmor %vm635_vm15, %vm636_vm10 }
  0x8f   :  { %vm646_vm0 = vweird.f32 %v1704_v38  ;;  %v1826_v23 = vsel %vm501_vm13, 1.0, %v598_v63  ;;  %v704_v4 = vmul.f32 %v933_v14, %v1412_v10  ;;  %v720_v44 = vmul.f32 %v934_v40, %v672_v25  ;;  %v2097_v14 = vld [vmem:[#allocation11_spill] sm:$0xff]  ;;  %v944_v40 = vld [vmem:[#allocation3 + $0xc0] sm:$0xff]  ;;  %vm1888_vm10 = vmor %vm473_vm12, %vm474_vm7 }
  0x90   :  { %v623_v47 = vsub.f32 1.5, %v622_v51  ;;  %v642_v24 = vmul.f32 0.5, %v641_v31  ;;  %vm655_vm11 = vweird.f32 %v2064_v21  ;;  %v661_v37 = vmul.f32 %v1766_v41, %v660_v36  ;;  %vm1879_vm15 = vmor %vm645_vm6, %vm646_vm0 }
  0x91   :  { %v733_v52 = vsub.f32 %v1593_v57, %v717_v17  ;;  %vm504_vm5 = vcmp.eq.f32.partialorder %v2053_v54, 0.0  ;;  %v705_v45 = vmul.f32 %v935_v26, %v1460_v61  ;;  %v721_v60 = vmul.f32 %v936_v35, %v673_v6 }
  0x92   :  { %v734_v11 = vsub.f32 %v1598_v9, %v718_v55  ;;  %v735_v10 = vsub.f32 %v1702_v50, %v719_v12  ;;  %v633_v16 = vsub.f32 1.5, %v632_v27  ;;  %v652_v39 = vmul.f32 0.5, %v651_v28  ;;  %v939_v9 = vld [vmem:[#allocation3 + $0xa8] sm:$0xff]  ;;  %v943_v28 = vld [vmem:[#allocation3 + $0x40] sm:$0xff] }
  0x93   :  { %vm656_vm13 = vweird.f32 %v1732_v53  ;;  %v678_v57 = vsel %vm502_vm1, 1.0, %v608_v18  ;;  %v706_v61 = vmul.f32 %v937_v42, %v1469_v3  ;;  %v707_v25 = vmul.f32 %v938_v2, %v1478_v32  ;;  %v940_v32 = vld [vmem:[#allocation3 + $0xb0] sm:$0xff] }
  0x94   :  { %v722_v49 = vmul.f32 %v939_v9, %v674_v19  ;;  %v736_v50 = vsub.f32 %v704_v4, %v720_v44  ;;  %v624_v33 = vmul.f32 %v1650_v8, %v623_v47  ;;  %v643_v59 = vsub.f32 1.5, %v642_v24  ;;  %vm1902_vm0 = vmor %vm655_vm11, %vm656_vm13  ;;  %v2105_v9 = vld [vmem:[#allocation16_spill] sm:$0xff] }
  0x95   :  { %v662_v6 = vmul.f32 0.5, %v661_v37  ;;  %v749_v63 = vand.u32 2147483647, %v733_v52  ;;  %vm315_vm3 = vcmp.eq.f32.partialorder %v1056_v34, 0.0  ;;  %v723_v15 = vmul.f32 %v940_v32, %v675_v30  ;;  %v2113_v30 = vld [vmem:[#allocation22_spill] sm:$0xff] }
  0x96   :  { %v737_v18 = vsub.f32 %v705_v45, %v721_v60  ;;  %v750_v48 = vand.u32 2147483647, %v734_v11  ;;  %v751_v19 = vand.u32 2147483647, %v735_v10  ;;  %v634_v51 = vmul.f32 %v1676_v43, %v633_v16  ;;  %v2102_v45 = vld [vmem:[#allocation14_spill] sm:$0xff] }
  0x97   :  { %v653_v31 = vsub.f32 1.5, %v652_v39  ;;  %v679_v36 = vsel %vm503_vm2, 1.0, %v618_v5  ;;  %v708_v17 = vmul.f32 %v941_v58, %v1486_v46  ;;  %vm316_vm1 = vcmp.eq.f32.partialorder %v2092_v7, 0.0  ;;  %v946_v11 = vld [vmem:[#allocation3 + $0xc8] sm:$0xff] }
  0x98   :  { %vm507_vm8 = vcmp.eq.f32.partialorder %v2064_v21, 0.0  ;;  %v724_v55 = vmul.f32 %v942_v20, %v1812_v62  ;;  %v738_v0 = vsub.f32 %v706_v61, %v722_v49  ;;  %v752_v22 = vand.u32 2147483647, %v736_v50  ;;  %v2114_v20 = vld [vmem:[#allocation12_spill] sm:$0xff]  ;;  %v953_v62 = vld [vmem:[#allocation3 + $0x68] sm:$0xff] }
  0x99   :  { %v816_v12 = vadd.f32 %v750_v48, %v749_v63  ;;  %v628_v46 = vsel %vm1850_vm9, %v1650_v8, %v624_v33  ;;  %v644_v5 = vmul.f32 %v1704_v38, %v643_v59  ;;  %v663_v27 = vsub.f32 1.5, %v662_v6  ;;  %v957_v21 = vld [vmem:[#allocation3 + $0x78] sm:$0xff] }
  0x9a   :  { %v709_v4 = vmul.f32 %v943_v28, %v2097_v14  ;;  %vm508_vm2 = vcmp.eq.f32.partialorder %v2070_v1, 0.0  ;;  %v725_v44 = vmul.f32 %v944_v40, %v1826_v23  ;;  %v739_v8 = vsub.f32 %v707_v25, %v723_v15  ;;  %v945_v23 = vld [vmem:[#allocation3 + $0x48] sm:$0xff]  ;;  %v947_v25 = vld [vmem:[#allocation3 + $0x50] sm:$0xff]  ;;  %v949_v15 = vld [vmem:[#allocation3 + $0x58] sm:$0xff] }
  0x9b   :  { %v753_v47 = vand.u32 2147483647, %v737_v18  ;;  %v817_v24 = vadd.f32 %v816_v12, %v751_v19  ;;  %v638_v52 = vsel %vm1864_vm4, %v1676_v43, %v634_v51  ;;  %v654_v26 = vmul.f32 %v1732_v53, %v653_v31  ;;  %v2111_v18 = vld [vmem:[#allocation23_spill] sm:$0xff]  ;;  %v950_v19 = vld [vmem:[#allocation3 + $0xd8] sm:$0xff]  ;;  %v2118_v40 = vld [vmem:[#allocation26_spill] sm:$0xff] }
  0x9c   :  { %vm666_vm6 = vweird.f32 %v1766_v41  ;;  %v710_v35 = vmul.f32 %v945_v23, %v2102_v45  ;;  %v726_v10 = vmul.f32 %v946_v11, %v678_v57  ;;  %v740_v16 = vsub.f32 %v708_v17, %v724_v55  ;;  %v948_v57 = vld [vmem:[#allocation3 + $0xd0] sm:$0xff] }
  0x9d   :  { %v754_v39 = vand.u32 2147483647, %v738_v0  ;;  %v818_v43 = vadd.f32 %v817_v24, %v752_v22  ;;  %v648_v42 = vsel %vm1879_vm15, %v1704_v38, %v644_v5  ;;  %v664_v61 = vmul.f32 %v1766_v41, %v663_v27  ;;  %v2109_v38 = vld [vmem:[#allocation24_spill] sm:$0xff]  ;;  %v951_v0 = vld [vmem:[#allocation3 + $0x60] sm:$0xff]  ;;  %v956_v23 = vld [vmem:[#allocation3 + $0xf0] sm:$0xff] }
  0x9e   :  { %v680_v2 = vsel %vm504_vm5, 1.0, %v628_v46  ;;  %v711_v49 = vmul.f32 %v947_v25, %v2105_v9  ;;  %vm2106_vm12 = vweird.f32 %v2070_v1  ;;  %v727_v33 = vmul.f32 %v948_v57, %v679_v36  ;;  %v2117_v22 = vld [vmem:[#allocation25_spill] sm:$0xff] }
  0x9f   :  { %vm1915_vm7 = vmor %vm2106_vm12, %vm666_vm6  ;;  %v741_v59 = vsub.f32 %v709_v4, %v725_v44  ;;  %v755_v6 = vand.u32 2147483647, %v739_v8  ;;  %v819_v63 = vadd.f32 %v818_v43, %v753_v47  ;;  %v476_v54 = vsel %vm1888_vm10, %v1294_v13, %v2109_v38  ;;  %v952_v46 = vld [vmem:[#allocation3 + $0xe0] sm:$0xff]  ;;  %v954_v44 = vld [vmem:[#allocation3 + $0xe8] sm:$0xff] }
  0xa0   :  { %v658_v3 = vsel %vm1902_vm0, %v1732_v53, %v654_v26  ;;  %vm2110_vm11 = vcmp.eq.f32.partialorder %v2054_v29, 0.0  ;;  %v712_v48 = vmul.f32 %v949_v15, %v2111_v18  ;;  %v728_v51 = vmul.f32 %v950_v19, %v680_v2 }
  0xa1   :  { %v681_v32 = vsel %vm2110_vm11, 1.0, %v638_v52  ;;  %v742_v31 = vsub.f32 %v710_v35, %v726_v10  ;;  %v756_v36 = vand.u32 2147483647, %v740_v16  ;;  %v820_v58 = vadd.f32 %v819_v63, %v754_v39  ;;  %v955_v52 = vld [vmem:[#allocation3 + $0x70] sm:$0xff]  ;;  %v958_v10 = vld [vmem:[#allocation3 + $0xf8] sm:$0xff] }
  0xa2   :  { %v2115_v13 = vsel %vm1524_vm14, %v2113_v30, %v2114_v20  ;;  %v668_v29 = vsel %vm1915_vm7, %v1766_v41, %v664_v61  ;;  %vm2116_vm5 = vcmp.eq.f32.partialorder %v2059_v56, 0.0  ;;  %v713_v12 = vmul.f32 %v951_v0, %v2117_v22 }
  0xa3   :  { %v491_v55 = vsel %vm315_vm3, 1.0, %v2115_v13  ;;  %v682_v53 = vsel %vm2116_vm5, 1.0, %v648_v42  ;;  %v729_v5 = vmul.f32 %v952_v46, %v681_v32  ;;  %v743_v27 = vsub.f32 %v711_v49, %v727_v33 }
  0xa4   :  { %v757_v28 = vand.u32 2147483647, %v741_v59  ;;  %v821_v14 = vadd.f32 %v820_v58, %v755_v6  ;;  %v492_v4 = vsel %vm316_vm1, 1.0, %v476_v54  ;;  %v683_v34 = vsel %vm507_vm8, 1.0, %v658_v3 }
  0xa5   :  { %v714_v41 = vmul.f32 %v953_v62, %v2118_v40  ;;  %v730_v56 = vmul.f32 %v954_v44, %v682_v53  ;;  %v744_v8 = vsub.f32 %v712_v48, %v728_v51  ;;  %v758_v47 = vand.u32 2147483647, %v742_v31 }
  0xa6   :  { %v822_v24 = vadd.f32 %v821_v14, %v756_v36  ;;  %v684_v37 = vsel %vm508_vm2, 1.0, %v668_v29  ;;  %v715_v26 = vmul.f32 %v955_v52, %v491_v55  ;;  %v731_v45 = vmul.f32 %v956_v23, %v683_v34 }
  0xa7   :  { %v745_v7 = vsub.f32 %v713_v12, %v729_v5  ;;  %v759_v35 = vand.u32 2147483647, %v743_v27  ;;  %v716_v11 = vmul.f32 %v957_v21, %v492_v4  ;;  %v732_v16 = vmul.f32 %v958_v10, %v684_v37 }
  0xa8   :  { %v823_v60 = vadd.f32 %v822_v24, %v757_v28  ;;  %v746_v39 = vsub.f32 %v714_v41, %v730_v56  ;;  %v760_v43 = vand.u32 2147483647, %v744_v8  ;;  %v747_v61 = vsub.f32 %v715_v26, %v731_v45 }
  0xa9   :  { %v761_v2 = vand.u32 2147483647, %v745_v7  ;;  %v748_v9 = vsub.f32 %v716_v11, %v732_v16 }
  0xaa   :  { %v824_v42 = vadd.f32 %v823_v60, %v758_v47  ;;  %v762_v1 = vand.u32 2147483647, %v746_v39  ;;  %v763_v50 = vand.u32 2147483647, %v747_v61 }
  0xab   :  { %v764_v33 = vand.u32 2147483647, %v748_v9 }
  0xac   :  { %v825_v25 = vadd.f32 %v824_v42, %v759_v35 }
  0xae   :  { %v826_v49 = vadd.f32 %v825_v25, %v760_v43 }
  0xb0   :  { %v827_v57 = vadd.f32 %v826_v49, %v761_v2 }
  0xb2   :  { %v828_v59 = vadd.f32 %v827_v57, %v762_v1 }
  0xb4   :  { %v829_v6 = vadd.f32 %v828_v59, %v763_v50 }
  0xb6   :  { %v830_v63 = vadd.f32 %v829_v6, %v764_v33 }
  0xb8   :  { %831 = vadd.xlane.f32.xlu0 %v830_v63 }
 0x12b   :  { %v832_v38 = vpop.xlane.xlu0 %831 }
 0x12c   :  { %v833_v54 = vrot.slane %v832_v38, 4 }
 0x12e   :  { %v834_v3 = vadd.f32 %v833_v54, %v832_v38 }
 0x130   :  { %v835_v32 = vrot.slane %v834_v3, 2 }
 0x132   :  { %v836_v15 = vadd.f32 %v835_v32, %v834_v3 }
 0x134   :  { %v837_v18 = vrot.slane %v836_v15, 1 }
 0x136   :  { %v838_v48 = vadd.f32 %v837_v18, %v836_v15 }
 0x138   :  { %859 = vpush %v838_v48 }
 0x169   :  { %s860_s15 = spop %859 }
 0x16a   :  { %s840_s16 = smul.f32 6.25e-05, %s860_s15 }
 0x16c   :  { %842 = sst [smem:[#allocation6]] %s840_s16 }
 0x16d   :  { %851 = dma.smem_to_hbm %s1002_s17, 16, %s849_s14, [#allocation5]  }
 0x16e   :  { %997 = dma.done.wait [#allocation5], 16  }
 0x16f   :  { %998 = vsyncadd [#allocation5], 4294967280 }
 0x170   :  { %856 = sfence }
 0x171   :  { %857 = vsyncpa [#allocation4], 1 }
 0x172   :  { %858 = vsyncpa [#allocation5], 1 }

</bundles_post_ra>
